<compile_context>
chip_gen: v6e
topology: v6e:2x2x1
jax: 0.10.0
libtpu: 0.0.40
codegen_flags: <defaults>
</compile_context>

<pallas_src>
import functools

import jax
import jax.numpy as jnp
from jax import lax
from jax.experimental import pallas as pl
from jax.experimental.pallas import tpu as pltpu

_LANES = 128


def _msm_kernel(x_ref, g_ref, b_ref, o_ref, *, eps, inv_n, n, apply_dtype):
    """x_ref/o_ref: (N, s_tile, 128); g_ref/b_ref: (1, 1, 128) VMEM-resident."""
    f32 = jnp.float32
    g = g_ref[0].astype(f32)                       # (1, 128)
    b = b_ref[0].astype(f32)                       # (1, 128)

    # Pass 1: batch mean.  Streamed per-sample so only one f32 slice is live.
    acc = x_ref[0].astype(f32)
    for i in range(1, n):
        acc = acc + x_ref[i].astype(f32)
    mean = acc * inv_n                             # (s_tile, 128)

    # Pass 2: biased variance (numerically stable two-pass form), streamed.
    d = x_ref[0].astype(f32) - mean
    vacc = d * d
    for i in range(1, n):
        d = x_ref[i].astype(f32) - mean
        vacc = vacc + d * d
    var = vacc * inv_n

    # Fused affine: y = x * scale + shift  (one FMA per element in the apply pass).
    scale = g * lax.rsqrt(var + eps)               # (s_tile, 128)
    shift = b - mean * scale
    scale_a = scale.astype(apply_dtype)
    shift_a = shift.astype(apply_dtype)
    for i in range(n):
        y = x_ref[i].astype(apply_dtype) * scale_a + shift_a
        o_ref[i] = y.astype(o_ref.dtype)


def _tpu_tuning():
    """Generation-aware block / VMEM budgets (conservative when detection fails)."""
    kind = ""
    try:
        kind = jax.devices()[0].device_kind.lower()
    except Exception:
        pass
    vmem_cap = 64 << 20                    # conservative default: v7x (64 MiB / TC)
    try:
        vmem_cap = int(pltpu.get_tpu_info().vmem_capacity_bytes)
    except Exception:
        if any(tag in kind for tag in ("v4", "v5", "v6")):
            vmem_cap = 128 << 20
    is_v5e = ("v5e" in kind) or ("v5 lite" in kind)
    two_tc = ("v7" in kind) or ("v4" in kind) or ("v5p" in kind)
    if vmem_cap >= (96 << 20) and "v7" not in kind:
        # v5e / v6e class: 128 MiB VMEM -> big blocks, generous scoped limit.
        return dict(target_block=12 << 20, vmem_limit=80 << 20,
                    vmem_ceiling=100 << 20,
                    min_blocks=2 * (2 if two_tc else 1),
                    bf16_valu=not is_v5e)
    # v7x class: 64 MiB VMEM per TensorCore, 2 TCs -> smaller blocks, >= 2 / core.
    return dict(target_block=7 << 20, vmem_limit=44 << 20,
                vmem_ceiling=56 << 20, min_blocks=4, bf16_valu=True)


def _pick_s_tile(S, N, itemsize, *, target_block_bytes, min_blocks):
    """s_tile: multiple of 8 (or == S when S <= 8), sized by the per-block VMEM
    budget and kept small enough that the grid has >= min_blocks steps."""
    if S <= 8:
        return S                                   # full second-minor extent
    bytes_per_srow = N * _LANES * itemsize
    budget_tile = max(8, (target_block_bytes // bytes_per_srow) // 8 * 8)
    parallel_tile = max(8, (S // min_blocks) // 8 * 8)
    s_pad = -(-S // 8) * 8                         # S rounded up to a multiple of 8
    return min(budget_tile, parallel_tile, s_pad)


def modality_specific_modulation(x, gamma, beta, modal_label, *, eps=1e-5,
                                 donate_x=False):
    """x: (N, C, H, W).  gamma/beta: (num_modality, C).  modal_label: int array."""
    N, C, H, W = x.shape
    if W != C:
        # PyTorch's (channels,) affine params broadcast against the last dim W.
        raise ValueError("original module's broadcasting requires W == channels")
    M = C * H * W
    if M % _LANES != 0 or _LANES % W != 0:
        raise ValueError("this kernel requires C*H*W % 128 == 0 and 128 % W == 0")

    # On-device modality selection (no host sync, jit-safe).
    g_sel = jnp.take(gamma, modal_label[0], axis=0)            # (C,) == (W,)
    b_sel = jnp.take(beta, modal_label[0], axis=0)
    # One 128-lane affine tile; identical for every row since 128 % W == 0.
    g_lane = jnp.tile(g_sel, _LANES // W).reshape(1, 1, _LANES)
    b_lane = jnp.tile(b_sel, _LANES // W).reshape(1, 1, _LANES)

    S = M // _LANES
    x3 = x.reshape(N, S, _LANES)

    tune = _tpu_tuning()
    s_tile = _pick_s_tile(S, N, x.dtype.itemsize,
                          target_block_bytes=tune["target_block"],
                          min_blocks=tune["min_blocks"])
    grid = (pl.cdiv(S, s_tile),)

    # bf16 apply pass on bf16-VALU generations (v6e/v7x); stats stay in f32.
    apply_dtype = (jnp.bfloat16
                   if (x.dtype == jnp.bfloat16 and tune["bf16_valu"])
                   else jnp.float32)

    # Scoped-VMEM limit: double-buffered in + out blocks plus f32 intermediates.
    block_bytes = N * s_tile * _LANES * x.dtype.itemsize
    inter_bytes = 8 * s_tile * _LANES * 4
    needed = 4 * block_bytes + 2 * inter_bytes + (1 << 20)
    vmem_limit = int(min(max(tune["vmem_limit"], needed), tune["vmem_ceiling"]))
    # TODO(synk): for very large N even an s_tile=8 block can exceed the budget;
    # that would need a two-phase stats+apply split (or a reduction grid axis).

    kernel = functools.partial(_msm_kernel, eps=float(eps), inv_n=1.0 / float(N),
                               n=N, apply_dtype=apply_dtype)
    out3 = pl.pallas_call(
        kernel,
        out_shape=jax.ShapeDtypeStruct((N, S, _LANES), x.dtype),
        grid_spec=pltpu.PrefetchScalarGridSpec(
            num_scalar_prefetch=0,
            grid=grid,
            in_specs=[
                pl.BlockSpec((N, s_tile, _LANES), lambda i: (0, i, 0)),
                pl.BlockSpec((1, 1, _LANES), lambda i: (0, 0, 0)),   # VMEM-resident
                pl.BlockSpec((1, 1, _LANES), lambda i: (0, 0, 0)),   # VMEM-resident
            ],
            out_specs=pl.BlockSpec((N, s_tile, _LANES), lambda i: (0, i, 0)),
        ),
        compiler_params=pltpu.CompilerParams(
            dimension_semantics=("parallel",),
            vmem_limit_bytes=vmem_limit,
        ),
        # Donating x removes the extra N*C*H*W output allocation when the caller
        # no longer needs x (off by default; the demo below reuses x).
        input_output_aliases=({0: 0} if donate_x else {}),
    )(x3, g_lane, b_lane)
    return out3.reshape(N, C, H, W)


if __name__ == "__main__":
    key = jax.random.PRNGKey(0)
    k_x, k_g, k_b = jax.random.split(key, 3)

    # Small shapes consistent with the module's 4D input; W == C is required by
    # the original module's broadcasting of (channels,) gamma/beta.
    N, C, H, W = 4, 16, 16, 16
    num_modality = 3
    eps = 1e-5

    x = jax.random.normal(k_x, (N, C, H, W), dtype=jnp.float32)
    gamma = 1.0 + 0.1 * jax.random.normal(k_g, (num_modality, C), dtype=jnp.float32)
    beta = 0.1 * jax.random.normal(k_b, (num_modality, C), dtype=jnp.float32)
    modal_label = jnp.array([1, 1, 1, 1], dtype=jnp.int32)

    msm = jax.jit(functools.partial(modality_specific_modulation, eps=eps))
    y = jax.block_until_ready(msm(x, gamma, beta, modal_label))

    # Pure-JAX reference of the exact PyTorch forward (training-mode stats).
    mean = x.mean(axis=0)
    var = x.var(axis=0)  # biased (ddof=0), matches unbiased=False
    x_hat = (x - mean) / jnp.sqrt(var + eps)
    g_ref = jnp.take(gamma, modal_label[0], axis=0)
    b_ref = jnp.take(beta, modal_label[0], axis=0)
    y_ref = g_ref * x_hat + b_ref  # (C,) broadcasts along trailing dim W

    assert y.shape == x.shape and y.dtype == x.dtype
    assert jnp.allclose(y, y_ref, atol=1e-5, rtol=1e-5)
    print("KERNEL_OK")
</pallas_src>

<mosaic_0001>
module attributes {stable_mosaic.version = 11 : i64} {
  func.func @_msm_kernel(%arg0: i32, %arg1: memref<4x8x128xf32, #tpu.memory_space<vmem>>, %arg2: memref<1x1x128xf32, #tpu.memory_space<vmem>>, %arg3: memref<1x1x128xf32, #tpu.memory_space<vmem>>, %arg4: memref<4x8x128xf32, #tpu.memory_space<vmem>>) attributes {dimension_semantics = [#tpu.dimension_semantics<parallel>], iteration_bounds = array<i64: 4>, scalar_prefetch = 0 : i64, scratch_operands = 0 : i64, tpu.core_type = #tpu.core_type<tc>, window_params = [{transform_indices = @transform_0, window_bounds = array<i64: 4, 8, 128>}, {pipeline_mode = #tpu.pipeline_mode<synchronous>, transform_indices = @transform_1, window_bounds = array<i64: 1, 1, 128>}, {pipeline_mode = #tpu.pipeline_mode<synchronous>, transform_indices = @transform_2, window_bounds = array<i64: 1, 1, 128>}, {transform_indices = @transform_3, window_bounds = array<i64: 4, 8, 128>}]} {
    %c0 = arith.constant 0 : index
    %c0_0 = arith.constant 0 : index
    %c0_1 = arith.constant 0 : index
    %0 = vector.load %arg2[%c0, %c0_0, %c0_1] : memref<1x1x128xf32, #tpu.memory_space<vmem>>, vector<1x1x128xf32>
    %1 = vector.shape_cast %0 : vector<1x1x128xf32> to vector<1x128xf32>
    %c0_2 = arith.constant 0 : index
    %c0_3 = arith.constant 0 : index
    %c0_4 = arith.constant 0 : index
    %2 = vector.load %arg3[%c0_2, %c0_3, %c0_4] : memref<1x1x128xf32, #tpu.memory_space<vmem>>, vector<1x1x128xf32>
    %3 = vector.shape_cast %2 : vector<1x1x128xf32> to vector<1x128xf32>
    %c0_5 = arith.constant 0 : index
    %c0_6 = arith.constant 0 : index
    %c0_7 = arith.constant 0 : index
    %4 = vector.load %arg1[%c0_5, %c0_6, %c0_7] : memref<4x8x128xf32, #tpu.memory_space<vmem>>, vector<1x8x128xf32>
    %5 = vector.shape_cast %4 : vector<1x8x128xf32> to vector<8x128xf32>
    %c1 = arith.constant 1 : index
    %c0_8 = arith.constant 0 : index
    %c0_9 = arith.constant 0 : index
    %6 = vector.load %arg1[%c1, %c0_8, %c0_9] : memref<4x8x128xf32, #tpu.memory_space<vmem>>, vector<1x8x128xf32>
    %7 = vector.shape_cast %6 : vector<1x8x128xf32> to vector<8x128xf32>
    %8 = arith.addf %5, %7 : vector<8x128xf32>
    %c2 = arith.constant 2 : index
    %c0_10 = arith.constant 0 : index
    %c0_11 = arith.constant 0 : index
    %9 = vector.load %arg1[%c2, %c0_10, %c0_11] : memref<4x8x128xf32, #tpu.memory_space<vmem>>, vector<1x8x128xf32>
    %10 = vector.shape_cast %9 : vector<1x8x128xf32> to vector<8x128xf32>
    %11 = arith.addf %8, %10 : vector<8x128xf32>
    %c3 = arith.constant 3 : index
    %c0_12 = arith.constant 0 : index
    %c0_13 = arith.constant 0 : index
    %12 = vector.load %arg1[%c3, %c0_12, %c0_13] : memref<4x8x128xf32, #tpu.memory_space<vmem>>, vector<1x8x128xf32>
    %13 = vector.shape_cast %12 : vector<1x8x128xf32> to vector<8x128xf32>
    %14 = arith.addf %11, %13 : vector<8x128xf32>
    %cst = arith.constant 2.500000e-01 : f32
    %15 = vector.broadcast %cst : f32 to vector<8x128xf32>
    %16 = arith.mulf %14, %15 : vector<8x128xf32>
    %c0_14 = arith.constant 0 : index
    %c0_15 = arith.constant 0 : index
    %c0_16 = arith.constant 0 : index
    %17 = vector.load %arg1[%c0_14, %c0_15, %c0_16] : memref<4x8x128xf32, #tpu.memory_space<vmem>>, vector<1x8x128xf32>
    %18 = vector.shape_cast %17 : vector<1x8x128xf32> to vector<8x128xf32>
    %19 = arith.subf %18, %16 : vector<8x128xf32>
    %20 = arith.mulf %19, %19 : vector<8x128xf32>
    %c1_17 = arith.constant 1 : index
    %c0_18 = arith.constant 0 : index
    %c0_19 = arith.constant 0 : index
    %21 = vector.load %arg1[%c1_17, %c0_18, %c0_19] : memref<4x8x128xf32, #tpu.memory_space<vmem>>, vector<1x8x128xf32>
    %22 = vector.shape_cast %21 : vector<1x8x128xf32> to vector<8x128xf32>
    %23 = arith.subf %22, %16 : vector<8x128xf32>
    %24 = arith.mulf %23, %23 : vector<8x128xf32>
    %25 = arith.addf %20, %24 : vector<8x128xf32>
    %c2_20 = arith.constant 2 : index
    %c0_21 = arith.constant 0 : index
    %c0_22 = arith.constant 0 : index
    %26 = vector.load %arg1[%c2_20, %c0_21, %c0_22] : memref<4x8x128xf32, #tpu.memory_space<vmem>>, vector<1x8x128xf32>
    %27 = vector.shape_cast %26 : vector<1x8x128xf32> to vector<8x128xf32>
    %28 = arith.subf %27, %16 : vector<8x128xf32>
    %29 = arith.mulf %28, %28 : vector<8x128xf32>
    %30 = arith.addf %25, %29 : vector<8x128xf32>
    %c3_23 = arith.constant 3 : index
    %c0_24 = arith.constant 0 : index
    %c0_25 = arith.constant 0 : index
    %31 = vector.load %arg1[%c3_23, %c0_24, %c0_25] : memref<4x8x128xf32, #tpu.memory_space<vmem>>, vector<1x8x128xf32>
    %32 = vector.shape_cast %31 : vector<1x8x128xf32> to vector<8x128xf32>
    %33 = arith.subf %32, %16 : vector<8x128xf32>
    %34 = arith.mulf %33, %33 : vector<8x128xf32>
    %35 = arith.addf %30, %34 : vector<8x128xf32>
    %cst_26 = arith.constant 2.500000e-01 : f32
    %36 = vector.broadcast %cst_26 : f32 to vector<8x128xf32>
    %37 = arith.mulf %35, %36 : vector<8x128xf32>
    %cst_27 = arith.constant 9.99999974E-6 : f32
    %38 = vector.broadcast %cst_27 : f32 to vector<8x128xf32>
    %39 = arith.addf %37, %38 : vector<8x128xf32>
    %40 = math.rsqrt %39 : vector<8x128xf32>
    %41 = vector.broadcast %1 : vector<1x128xf32> to vector<8x128xf32>
    %42 = arith.mulf %41, %40 : vector<8x128xf32>
    %43 = arith.mulf %16, %42 : vector<8x128xf32>
    %44 = vector.broadcast %3 : vector<1x128xf32> to vector<8x128xf32>
    %45 = arith.subf %44, %43 : vector<8x128xf32>
    %c0_28 = arith.constant 0 : index
    %c0_29 = arith.constant 0 : index
    %c0_30 = arith.constant 0 : index
    %46 = vector.load %arg1[%c0_28, %c0_29, %c0_30] : memref<4x8x128xf32, #tpu.memory_space<vmem>>, vector<1x8x128xf32>
    %47 = vector.shape_cast %46 : vector<1x8x128xf32> to vector<8x128xf32>
    %48 = arith.mulf %47, %42 : vector<8x128xf32>
    %49 = arith.addf %48, %45 : vector<8x128xf32>
    %c0_31 = arith.constant 0 : index
    %c0_32 = arith.constant 0 : index
    %c0_33 = arith.constant 0 : index
    %50 = vector.load %arg4[%c0_31, %c0_32, %c0_33] : memref<4x8x128xf32, #tpu.memory_space<vmem>>, vector<1x8x128xf32>
    %51 = vector.shape_cast %50 : vector<1x8x128xf32> to vector<8x128xf32>
    %52 = vector.shape_cast %49 : vector<8x128xf32> to vector<1x8x128xf32>
    tpu.vector_store %arg4[%c0_31, %c0_32, %c0_33], %52 {strides = array<i32>} : memref<4x8x128xf32, #tpu.memory_space<vmem>>, vector<1x8x128xf32>,
    %c1_34 = arith.constant 1 : index
    %c0_35 = arith.constant 0 : index
    %c0_36 = arith.constant 0 : index
    %53 = vector.load %arg1[%c1_34, %c0_35, %c0_36] : memref<4x8x128xf32, #tpu.memory_space<vmem>>, vector<1x8x128xf32>
    %54 = vector.shape_cast %53 : vector<1x8x128xf32> to vector<8x128xf32>
    %55 = arith.mulf %54, %42 : vector<8x128xf32>
    %56 = arith.addf %55, %45 : vector<8x128xf32>
    %c1_37 = arith.constant 1 : index
    %c0_38 = arith.constant 0 : index
    %c0_39 = arith.constant 0 : index
    %57 = vector.load %arg4[%c1_37, %c0_38, %c0_39] : memref<4x8x128xf32, #tpu.memory_space<vmem>>, vector<1x8x128xf32>
    %58 = vector.shape_cast %57 : vector<1x8x128xf32> to vector<8x128xf32>
    %59 = vector.shape_cast %56 : vector<8x128xf32> to vector<1x8x128xf32>
    tpu.vector_store %arg4[%c1_37, %c0_38, %c0_39], %59 {strides = array<i32>} : memref<4x8x128xf32, #tpu.memory_space<vmem>>, vector<1x8x128xf32>,
    %c2_40 = arith.constant 2 : index
    %c0_41 = arith.constant 0 : index
    %c0_42 = arith.constant 0 : index
    %60 = vector.load %arg1[%c2_40, %c0_41, %c0_42] : memref<4x8x128xf32, #tpu.memory_space<vmem>>, vector<1x8x128xf32>
    %61 = vector.shape_cast %60 : vector<1x8x128xf32> to vector<8x128xf32>
    %62 = arith.mulf %61, %42 : vector<8x128xf32>
    %63 = arith.addf %62, %45 : vector<8x128xf32>
    %c2_43 = arith.constant 2 : index
    %c0_44 = arith.constant 0 : index
    %c0_45 = arith.constant 0 : index
    %64 = vector.load %arg4[%c2_43, %c0_44, %c0_45] : memref<4x8x128xf32, #tpu.memory_space<vmem>>, vector<1x8x128xf32>
    %65 = vector.shape_cast %64 : vector<1x8x128xf32> to vector<8x128xf32>
    %66 = vector.shape_cast %63 : vector<8x128xf32> to vector<1x8x128xf32>
    tpu.vector_store %arg4[%c2_43, %c0_44, %c0_45], %66 {strides = array<i32>} : memref<4x8x128xf32, #tpu.memory_space<vmem>>, vector<1x8x128xf32>,
    %c3_46 = arith.constant 3 : index
    %c0_47 = arith.constant 0 : index
    %c0_48 = arith.constant 0 : index
    %67 = vector.load %arg1[%c3_46, %c0_47, %c0_48] : memref<4x8x128xf32, #tpu.memory_space<vmem>>, vector<1x8x128xf32>
    %68 = vector.shape_cast %67 : vector<1x8x128xf32> to vector<8x128xf32>
    %69 = arith.mulf %68, %42 : vector<8x128xf32>
    %70 = arith.addf %69, %45 : vector<8x128xf32>
    %c3_49 = arith.constant 3 : index
    %c0_50 = arith.constant 0 : index
    %c0_51 = arith.constant 0 : index
    %71 = vector.load %arg4[%c3_49, %c0_50, %c0_51] : memref<4x8x128xf32, #tpu.memory_space<vmem>>, vector<1x8x128xf32>
    %72 = vector.shape_cast %71 : vector<1x8x128xf32> to vector<8x128xf32>
    %73 = vector.shape_cast %70 : vector<8x128xf32> to vector<1x8x128xf32>
    tpu.vector_store %arg4[%c3_49, %c0_50, %c0_51], %73 {strides = array<i32>} : memref<4x8x128xf32, #tpu.memory_space<vmem>>, vector<1x8x128xf32>,
    return
  }
  func.func @transform_0(%arg0: i32) -> (i32, i32, i32) {
    %c0_i32 = arith.constant 0 : i32
    %c0_i32_0 = arith.constant 0 : i32
    %c0_i32_1 = arith.constant 0 : i32
    return %c0_i32, %arg0, %c0_i32_0 : i32, i32, i32
  }
  func.func @transform_1(%arg0: i32) -> (i32, i32, i32) {
    %c0_i32 = arith.constant 0 : i32
    %c0_i32_0 = arith.constant 0 : i32
    %c0_i32_1 = arith.constant 0 : i32
    %c0_i32_2 = arith.constant 0 : i32
    return %c0_i32, %c0_i32_0, %c0_i32_1 : i32, i32, i32
  }
  func.func @transform_2(%arg0: i32) -> (i32, i32, i32) {
    %c0_i32 = arith.constant 0 : i32
    %c0_i32_0 = arith.constant 0 : i32
    %c0_i32_1 = arith.constant 0 : i32
    %c0_i32_2 = arith.constant 0 : i32
    return %c0_i32, %c0_i32_0, %c0_i32_1 : i32, i32, i32
  }
  func.func @transform_3(%arg0: i32) -> (i32, i32, i32) {
    %c0_i32 = arith.constant 0 : i32
    %c0_i32_0 = arith.constant 0 : i32
    %c0_i32_1 = arith.constant 0 : i32
    return %c0_i32, %arg0, %c0_i32_0 : i32, i32, i32
  }
}

</mosaic_0001>

<bundles_post_ra>
// kernel: tile.14
= control target key start
LH: loop header
LB: loop body
LE: loop exit
PB: predicated region body
PF: predicated region fallthrough
CT: control target
= control target key end

     0   :  { %s69_s10 = smov 112   ;;  %s70_s11 = smov 80   ;;  %vm3_vm0 = vcmask 130048   ;;  %vm9_vm1 = vcmask 1048448   ;;  %vm15_vm2 = vcmask 917248   ;;  %vm21_vm3 = vcmask 786048   ;;  %s113_s0 = inlined_call_operand.vmem [shape: f32[8,16], index: 0, kind: input, shape index: {}]   ;;  %s114_s1 = inlined_call_operand.vmem [shape: f32[1,1,128], index: 1, kind: output, shape index: {}]  }
   0x1   :  { %v55_v0 = vld [vmem:[%s113_s0 + $0x7] sm:$0x1]   ;;  %v57_v1 = vld [vmem:[%s113_s0 + $0x5] sm:$0x1]   ;;  %v56_v2 = vld [vmem:[%s113_s0 + $0x6] sm:$0x1]  }
   0x2   :  { %7 = vrot.lane.b32.xlu0 %v55_v0, %s69_s10  ;;  %19 = vrot.lane.b32.xlu1 %v57_v1, %s70_s11  ;;  %v58_v3 = vld [vmem:[%s113_s0 + $0x4] sm:$0x1]   ;;  %v2_v4 = vld [vmem:[%s113_s0] sm:$0x1]   ;;  %s71_s18 = smov 96   ;;  %s72_s19 = smov 64  }
   0x3   :  { %4 = vst.msk [vmem:[#allocation0] sm:$0x1] %vm3_vm0, %v2_v4   ;;  %v59_v5 = vld [vmem:[%s113_s0 + $0x3] sm:$0x1]   ;;  %v60_v6 = vld [vmem:[%s113_s0 + $0x2] sm:$0x1]  }
   0x4   :  { %s73_s24 = smov 48   ;;  %s74_s25 = smov 32   ;;  %v61_v7 = vld [vmem:[%s113_s0 + $0x1] sm:$0x1]   ;;  %vm27_vm4 = vcmask 654848   ;;  %vm33_vm5 = vcmask 523648  }
   0x5   :  { %s75_s0 = smov 16   ;;  %vm39_vm6 = vcmask 392448   ;;  %vm45_vm7 = vcmask 261248  }
   0x6   :  { %13 = vrot.lane.b32.xlu0 %v56_v2, %s71_s18  ;;  %25 = vrot.lane.b32.xlu1 %v58_v3, %s72_s19 }
   0xa   :  { %31 = vrot.lane.b32.xlu0 %v59_v5, %s73_s24  ;;  %37 = vrot.lane.b32.xlu1 %v60_v6, %s74_s25 }
   0xe   :  { %43 = vrot.lane.b32.xlu0 %v61_v7, %s75_s0 }
  0x74   :  { %v8_v8 = vpop.permute.xlu0 %7   ;;  %v20_v9 = vpop.permute.xlu1 %19  }
  0x75   :  { %10 = vst.msk [vmem:[#allocation0] sm:$0x1] %vm9_vm1, %v8_v8  }
  0x78   :  { %v14_v10 = vpop.permute.xlu0 %13   ;;  %v26_v11 = vpop.permute.xlu1 %25  }
  0x79   :  { %16 = vst.msk [vmem:[#allocation0] sm:$0x1] %vm15_vm2, %v14_v10  }
  0x7a   :  { %22 = vst.msk [vmem:[#allocation0] sm:$0x1] %vm21_vm3, %v20_v9  }
  0x7b   :  { %28 = vst.msk [vmem:[#allocation0] sm:$0x1] %vm27_vm4, %v26_v11  }
  0x7c   :  { %v32_v12 = vpop.permute.xlu0 %31   ;;  %v38_v13 = vpop.permute.xlu1 %37  }
  0x7d   :  { %34 = vst.msk [vmem:[#allocation0] sm:$0x1] %vm33_vm5, %v32_v12  }
  0x7e   :  { %40 = vst.msk [vmem:[#allocation0] sm:$0x1] %vm39_vm6, %v38_v13  }
  0x80   :  { %v44_v14 = vpop.permute.xlu0 %43  }
  0x81   :  { %46 = vst.msk [vmem:[#allocation0] sm:$0x1] %vm45_vm7, %v44_v14  }
  0x88   :  { %v51_v15 = vld [vmem:[#allocation0] sm:$0x1] }
  0x89   :  { %54 = vst [vmem:[%s114_s1] sm:$0x1] %v51_v15 }

// kernel: tile.13
= control target key start
LH: loop header
LB: loop body
LE: loop exit
PB: predicated region body
PF: predicated region fallthrough
CT: control target
= control target key end

     0   :  { %s22_s0 = inlined_call_operand.vmem [shape: f32[16], index: 0, kind: input, shape index: {}]   ;;  %s23_s1 = inlined_call_operand.vmem [shape: f32[8,16], index: 1, kind: output, shape index: {}]  }
   0x1   :  { %v4_v0 = vld [vmem:[%s22_s0] ss:$0 sm:$0xff] }
   0x2   :  { %5 = vst [vmem:[%s23_s1] sm:$0xff] %v4_v0 }

// kernel: modality_specific_modulation.1
= control target key start
LH: loop header
LB: loop body
LE: loop exit
PB: predicated region body
PF: predicated region fallthrough
CT: control target
= control target key end

     0   :  { %s476_s12 = smov 0   ;;  %s478_s13 = smov 0   ;;  %s546_s0 = inlined_call_operand.vmem [shape: f32[4,32,128], index: 0, kind: input, shape index: {}]   ;;  %s547_s1 = inlined_call_operand.vmem [shape: f32[1,1,128], index: 1, kind: input, shape index: {}]   ;;  %s548_s2 = inlined_call_operand.vmem [shape: f32[1,1,128], index: 2, kind: input, shape index: {}]   ;;  %s549_s3 = inlined_call_operand.vmem [shape: f32[4,32,128], index: 3, kind: output, shape index: {}]  }
   0x1   :  { %s480_s14 = smov 0  }
   0x2 LB: > { %s382_s15 = sadd.s32 4294967295, %s454_s14   ;;  %s493_s16 = sadd.s32 1, %s454_s14   ;;  %s454_s14 = sphi %s480_s14, %s553_s14   ;;  %s450_s13 = sphi %s478_s13, %s552_s13   ;;  %s446_s12 = sphi %s476_s12, %s551_s12  }
   0x3   : > { %s17_s17 = ssub.s32 %s454_s14, %s493_s16  ;;  %s20_s18 = sadd.s32 1, %s450_s13 }
   0x4   : > { %p18_p0 = scmp.eq.s32.totalorder %s17_s17, 0  ;;  %p27_p1 = scmp.ne.s32.totalorder %s450_s13, %s446_s12 }
   0x5   : > { %p28_p2 = scmp.eq.s32.totalorder %s454_s14, 0  ;;  %p99_p3 = scmp.eq.s32.totalorder %s382_s15, 3 }
   0x6   : > { %s504_s19 = scalar_select %p18_p0, %s450_s13, %s20_s18  }
   0x7   : > { %p29_p4 = por %p28_p2, %p27_p1  ;;  %p506_p5 = por %p99_p3, %p27_p1 }
   0x8   : > { %p385_p6 = scmp.ge.s32.totalorder %s454_s14, 4 }
   0xa   : > { %127 = sbr.rel (%p385_p6) target bundleno = 23 (0x17), region = 24 }
   0xf   : > { %130 = sbr.rel (!%p29_p4) target bundleno = 23 (0x17), region = 28  ;;  %s132_s21 = sand.u32 (%p29_p4), 1, %s450_s13  }
  0x10   : > { %s387_s22 = sshll.u32 (%p29_p4), %s454_s14, 3  ;;  %s386_s23 = sshll.u32 (%p29_p4), %s132_s21, 5 }
  0x11   : > { %s136_s26 = scalar_lea.vmem (%p29_p4), %s546_s0, %s387_s22  ;;  %s134_s27 = scalar_lea.vmem (%p29_p4), [#allocation2], %s386_s23 }
  0x12   : > { %v171_v0 = vld [vmem:[%s136_s26] sm:$0xff] (%p29_p4) }
  0x13   : > { %v173_v1 = vld [vmem:[%s136_s26 + $0x20] sm:$0xff] (%p29_p4)  ;;  %172 = vst [vmem:[%s134_s27] sm:$0xff] (%p29_p4), %v171_v0 }
  0x14   : > { %v175_v2 = vld [vmem:[%s136_s26 + $0x40] sm:$0xff]  ;;  %174 = vst [vmem:[%s134_s27 + $0x8] sm:$0xff] %v173_v1 }
  0x15   : > { %176 = vst [vmem:[%s134_s27 + $0x10] sm:$0xff] %v175_v2  ;;  %v177_v3 = vld [vmem:[%s136_s26 + $0x60] sm:$0xff] }
  0x16   : > { %178 = vst [vmem:[%s134_s27 + $0x18] sm:$0xff] %v177_v3 }
  0x17 PF: > { %p388_p7 = scmp.ge.s32.totalorder %s454_s14, 1  ;;  %p183_p8 = scmp.lt.s32.totalorder %s454_s14, 5 }
  0x19   : > { %p184_p9 = pnand %p388_p7, %p183_p8 }
  0x1a   : > { %s190_s28 = sand.u32 (!%p184_p9), 1, %s446_s12  }
  0x1b   : > { %187 = sbr.rel (%p184_p9) target bundleno = 87 (0x57), region = 66  ;;  %s519_s29 = sshll.u32 (!%p184_p9), %s190_s28, 5 }
  0x1c   : > { %s192_s30 = scalar_lea.vmem (!%p184_p9), [#allocation2], %s519_s29  ;;  %s211_s8 = scalar_lea.vmem (!%p184_p9), [#allocation3], %s519_s29 }
  0x20   : > { %v214_v4 = vld [vmem:[%s192_s30] sm:$0xff]  ;;  %v391_v5 = vld [vmem:[%s192_s30 + $0x8] sm:$0xff]  ;;  %v392_v6 = vld [vmem:[%s192_s30 + $0x10] sm:$0xff]  ;;  %s403_s9 = sshll.u32 (%p506_p5), %s382_s15, 3 }
  0x21   : > { %v217_v7 = vadd.f32 %v391_v5, %v214_v4  ;;  %v393_v8 = vld [vmem:[%s192_s30 + $0x18] sm:$0xff]  ;;  %v394_v25 = vld [vmem:[%s547_s1] ss:$0 sm:$0xff]  ;;  %s280_s12 = scalar_lea.vmem (%p506_p5), %s549_s3, %s403_s9 }
  0x22   : > { %v395_v28 = vld [vmem:[%s548_s2] ss:$0 sm:$0xff] }
  0x23   : > { %v220_v9 = vadd.f32 %v392_v6, %v217_v7 }
  0x25   : > { %v223_v10 = vadd.f32 %v393_v8, %v220_v9 }
  0x27   : > { %v224_v11 = vmul.f32 0.25, %v223_v10 }
  0x29   : > { %v225_v12 = vsub.f32 %v214_v4, %v224_v11  ;;  %v227_v13 = vsub.f32 %v391_v5, %v224_v11  ;;  %v230_v14 = vsub.f32 %v392_v6, %v224_v11  ;;  %v233_v15 = vsub.f32 %v393_v8, %v224_v11 }
  0x2b   : > { %v226_v16 = vmul.f32 %v225_v12, %v225_v12  ;;  %v228_v17 = vmul.f32 %v227_v13, %v227_v13  ;;  %v231_v18 = vmul.f32 %v230_v14, %v230_v14  ;;  %v234_v20 = vmul.f32 %v233_v15, %v233_v15 }
  0x2d   : > { %v229_v19 = vadd.f32 %v228_v17, %v226_v16 }
  0x2f   : > { %v232_v21 = vadd.f32 %v231_v18, %v229_v19 }
  0x31   : > { %v235_v22 = vadd.f32 %v234_v20, %v232_v21 }
  0x33   : > { %v236_v23 = vmul.f32 0.25, %v235_v22 }
  0x35   : > { %v237_v24 = vadd.f32 1e-05, %v236_v23 }
  0x37   : > { %430 = vrsqrt.f32 %v237_v24 }
  0x44   : > { %v431_v26 = vpop.eup %430 }
  0x45   : > { %v245_v27 = vmul.f32 %v431_v26, %v394_v25 }
  0x47   : > { %v246_v29 = vmul.f32 %v245_v27, %v224_v11  ;;  %v254_v30 = vmul.f32 %v245_v27, %v214_v4  ;;  %v258_v31 = vmul.f32 %v391_v5, %v245_v27  ;;  %v263_v32 = vmul.f32 %v392_v6, %v245_v27 }
  0x48   : > { %v268_v33 = vmul.f32 %v393_v8, %v245_v27 }
  0x49   : > { %v253_v34 = vsub.f32 %v395_v28, %v246_v29 }
  0x4a   : > { %278 = sbr.rel (!%p506_p5) target bundleno = 87 (0x57), region = 74 }
  0x4b   : > { %v255_v35 = vadd.f32 %v254_v30, %v253_v34  ;;  %v259_v36 = vadd.f32 %v258_v31, %v253_v34  ;;  %v264_v37 = vadd.f32 %v263_v32, %v253_v34  ;;  %v269_v38 = vadd.f32 %v268_v33, %v253_v34 }
  0x4d   : > { %256 = vst [vmem:[%s211_s8] sm:$0xff] %v255_v35  ;;  %397 = vst [vmem:[%s211_s8 + $0x8] sm:$0xff] %v259_v36 }
  0x4e   : > { %399 = vst [vmem:[%s211_s8 + $0x10] sm:$0xff] %v264_v37  ;;  %401 = vst [vmem:[%s211_s8 + $0x18] sm:$0xff] %v269_v38 }
  0x54   : > { %v315_v39 = vld [vmem:[%s211_s8] sm:$0xff]  ;;  %v317_v40 = vld [vmem:[%s211_s8 + $0x8] sm:$0xff] }
  0x55   : > { %v319_v41 = vld [vmem:[%s211_s8 + $0x10] sm:$0xff]  ;;  %v321_v42 = vld [vmem:[%s211_s8 + $0x18] sm:$0xff]  ;;  %316 = vst [vmem:[%s280_s12] sm:$0xff] %v315_v39  ;;  %318 = vst [vmem:[%s280_s12 + $0x20] sm:$0xff] %v317_v40 }
  0x56   : > { %320 = vst [vmem:[%s280_s12 + $0x40] sm:$0xff] %v319_v41  ;;  %322 = vst [vmem:[%s280_s12 + $0x60] sm:$0xff] %v321_v42 }
  0x57 PF: > { %p10_p10 = scmp.ge.s32.totalorder %s493_s16, 6   ;;  %s551_s12 = smov %s450_s13 }
  0x58   : > { %s552_s13 = smov %s504_s19  ;;  %s553_s14 = smov %s493_s16 }
  0x59   :  { %12 = sbr.rel (!%p10_p10) target bundleno = 2 (0x2), region = 149 }

</bundles_post_ra>
